<compile_context>
chip_gen: v7x
topology: tpu7x:2x2x1
jax: 0.10.0
libtpu: 0.0.40
codegen_flags: <defaults>
</compile_context>

<pallas_src>
import jax
import jax.numpy as jnp
from jax.experimental import pallas as pl
from jax.experimental.pallas import tpu as pltpu

BN_EPS = 1e-5
LEAKY_SLOPE = 0.01  # F.leaky_relu default negative_slope


def _round_up(n, m):
    return ((n + m - 1) // m) * m


def _batchnorm(x):
    """Training-mode BN with biased variance, identity affine.

    sum(x) and sum(x*x) are independent sublane reductions (overlap in the
    XLU); x - mean is computed exactly once.
    """
    inv_n = 1.0 / x.shape[0]
    s1 = jnp.sum(x, axis=0, keepdims=True)
    s2 = jnp.sum(x * x, axis=0, keepdims=True)
    mean = s1 * inv_n
    var = jnp.maximum(s2 * inv_n - mean * mean, 0.0)
    return (x - mean) * jax.lax.rsqrt(var + BN_EPS)


def _batchnorm_ref(x):
    mean = jnp.mean(x, axis=0, keepdims=True)
    var = jnp.mean((x - mean) * (x - mean), axis=0, keepdims=True)
    return (x - mean) * jax.lax.rsqrt(var + BN_EPS)


def _leaky_relu(x):
    return jnp.where(x > 0, x, LEAKY_SLOPE * x)


def pack_weights(w1, w2, w3, w4):
    """One-time packing of all weights into a single lane-dense [R, 256] buffer."""
    state_size, size1 = w1.shape
    size2 = w2.shape[1]
    size3 = w3.shape[1]
    C = max(size1, size2, size3)

    def blk(w):
        r, c = w.shape
        buf = jnp.zeros((_round_up(r, 8), C), jnp.float32)
        return buf.at[:r, :c].set(w.astype(jnp.float32))

    blocks = [
        blk(w1),            # dense1
        blk(w2[:size1]),    # dense2, xs part
        blk(w2[size1:]),    # dense2, action part (zero-padded rows)
        blk(w3),            # dense3 (cols zero-padded to C)
        blk(w4.T),          # dense4 weight as a single row
    ]
    offs, row = [], 0
    for b in blocks:
        offs.append(row)
        row += b.shape[0]
    return jnp.concatenate(blocks, axis=0), tuple(offs), C


def _make_kernel(state_size, action_size, size1, size2, size3, offs):
    o1, o2s, o2a, o3, o4 = offs
    r2a = _round_up(action_size, 8)

    def critic_kernel(state_ref, action_ref, w_ref, b4_ref, out_ref):
        state = state_ref[...]        # [B, state_size]
        action = action_ref[...]      # [B, action_size]
        B = state.shape[0]

        # ---- dense1 -> bn1 -> leaky_relu (MXU) ----
        xs = jnp.dot(state, w_ref[pl.ds(o1, state_size), :],
                     preferred_element_type=jnp.float32)
        xs = _leaky_relu(_batchnorm(xs))

        # ---- dense2 on cat((xs, action), dim=1) ----
        # Two back-to-back MXU pushes (the tiny-K action push pipelines behind
        # the K=size1 push), then a single add; replaces the old 4-deep
        # dependent broadcast-FMA chain on the serial path.
        pad = r2a - action_size
        if pad:
            action_k = jnp.concatenate(
                [action, jnp.zeros((B, pad), jnp.float32)], axis=1)
        else:
            action_k = action
        x = (jnp.dot(xs, w_ref[pl.ds(o2s, size1), :],
                     preferred_element_type=jnp.float32)
             + jnp.dot(action_k, w_ref[pl.ds(o2a, r2a), :],
                       preferred_element_type=jnp.float32))
        x = _leaky_relu(_batchnorm(x))

        # ---- dense3 -> bn3 -> leaky_relu ----
        # Lane slice to the true width size3 (lane-tile aligned => free), so
        # bn3 / leaky3 / the final reduce operate on 1 vreg row, not 2.
        x = jnp.dot(x, w_ref[pl.ds(o3, size2), :size3],
                    preferred_element_type=jnp.float32)
        x = _leaky_relu(_batchnorm(x))

        # ---- dense4 (out_features = 1): VPU multiply + cross-lane reduce ----
        w4row = w_ref[pl.ds(o4, 1), :size3]       # [1, size3]
        out = jnp.sum(x * w4row, axis=-1, keepdims=True) + b4_ref[0, 0]
        out_ref[...] = out.astype(out_ref.dtype)

    return critic_kernel


def critic_forward(state, action, wpack, b4, dims, offs):
    """Run the critic on N independent minibatches in one pallas_call.

    state : [N, B, state_size] (or [B, state_size]); action likewise.
    Each leading entry gets its own BatchNorm batch statistics, exactly as N
    separate module calls.  The packed-weight block has a constant index_map,
    so it is DMA'd once and stays resident in VMEM across the N grid steps;
    the N axis is "parallel" so minibatches shard across both TCs on v7x.
    """
    state_size, action_size, size1, size2, size3 = dims

    squeeze = state.ndim == 2
    if squeeze:
        state, action = state[None], action[None]
    N, B, _ = state.shape

    kernel = _make_kernel(state_size, action_size, size1, size2, size3, offs)
    b4_smem = jnp.reshape(b4.astype(jnp.float32), (1, 1))

    out = pl.pallas_call(
        kernel,
        out_shape=jax.ShapeDtypeStruct((N, B, 1), jnp.float32),
        grid_spec=pltpu.PrefetchScalarGridSpec(
            num_scalar_prefetch=0,
            grid=(N,),
            in_specs=[
                pl.BlockSpec((None, B, state_size), lambda n: (n, 0, 0)),
                pl.BlockSpec((None, B, action_size), lambda n: (n, 0, 0)),
                # Constant block index => fetched once, resident across steps.
                pl.BlockSpec(wpack.shape, lambda n: (0, 0)),
                pl.BlockSpec(memory_space=pltpu.MemorySpace.SMEM),     # b4
            ],
            out_specs=pl.BlockSpec((None, B, 1), lambda n: (n, 0, 0)),
        ),
        compiler_params=pltpu.CompilerParams(
            dimension_semantics=("parallel",)),
    )(state, action, wpack, b4_smem)

    return out[0] if squeeze else out


def init_params(key, state_size, action_size, size1=256, size2=256, size3=128):
    """Deterministic init mirroring the module's reset_parameters().

    hidden_init uses layer.weight.size(0) = out_features in PyTorch; dense3 is
    subsequently overwritten with U(-0.003, 0.003); dense4 keeps the default
    nn.Linear init (+-1/sqrt(in_features)).
    """
    k1, k2, k3, k4w, k4b = jax.random.split(key, 5)
    u = lambda k, shp, lim: jax.random.uniform(k, shp, jnp.float32, -lim, lim)

    lim1 = 1.0 / (size1 ** 0.5)
    lim2 = 1.0 / (size2 ** 0.5)
    lim4 = 1.0 / (size3 ** 0.5)

    w1 = u(k1, (state_size, size1), lim1)              # [in, out] (pre-transposed)
    w2 = u(k2, (size1 + action_size, size2), lim2)
    w3 = u(k3, (size2, size3), 0.003)
    w4 = u(k4w, (size3, 1), lim4)
    b4 = u(k4b, (1, 1), lim4)
    return (w1, w2, w3, w4, b4)


def reference_forward(state, action, params):
    w1, w2, w3, w4, b4 = params
    xs = _leaky_relu(_batchnorm_ref(state @ w1))
    x = _leaky_relu(_batchnorm_ref(jnp.concatenate([xs, action], axis=1) @ w2))
    x = _leaky_relu(_batchnorm_ref(x @ w3))
    return x @ w4 + b4


if __name__ == "__main__":
    B, STATE, ACTION = 8, 24, 4
    SIZE1, SIZE2, SIZE3 = 256, 256, 128
    N_BATCHES = 4

    key = jax.random.PRNGKey(0)
    ks, ka, kp = jax.random.split(key, 3)
    state = jax.random.normal(ks, (N_BATCHES, B, STATE), jnp.float32)
    action = jax.random.normal(ka, (N_BATCHES, B, ACTION), jnp.float32)
    params = init_params(kp, STATE, ACTION, SIZE1, SIZE2, SIZE3)
    w1, w2, w3, w4, b4 = params

    # One-time weight packing (amortized across calls).
    wpack, offs, _ = pack_weights(w1, w2, w3, w4)
    dims = (STATE, ACTION, SIZE1, SIZE2, SIZE3)

    # Multi-minibatch path (weight DMA amortized across the grid axis).
    out = critic_forward(state, action, wpack, b4, dims, offs)
    out = jax.block_until_ready(out)

    ref = jax.vmap(lambda s, a: reference_forward(s, a, params))(state, action)
    assert out.shape == (N_BATCHES, B, 1)
    assert jnp.allclose(out, ref, atol=1e-4, rtol=1e-4), float(
        jnp.max(jnp.abs(out - ref)))

    # Single-minibatch (2-D input) path, matching the module's call signature.
    out1 = critic_forward(state[0], action[0], wpack, b4, dims, offs)
    out1 = jax.block_until_ready(out1)
    assert out1.shape == (B, 1)
    assert jnp.allclose(out1, ref[0], atol=1e-4, rtol=1e-4)

    print("KERNEL_OK")
</pallas_src>

<mosaic_0001>
module attributes {stable_mosaic.version = 11 : i64} {
  func.func @critic_kernel(%arg0: i32, %arg1: memref<1x8x24xf32, #tpu.memory_space<vmem>>, %arg2: memref<1x8x4xf32, #tpu.memory_space<vmem>>, %arg3: memref<552x256xf32, #tpu.memory_space<vmem>>, %arg4: memref<1x1xf32, #tpu.memory_space<smem>>, %arg5: memref<1x8x1xf32, #tpu.memory_space<vmem>>) attributes {dimension_semantics = [#tpu.dimension_semantics<parallel>], iteration_bounds = array<i64: 4>, scalar_prefetch = 0 : i64, scratch_operands = 0 : i64, tpu.core_type = #tpu.core_type<tc>, window_params = [{transform_indices = @transform_0, window_bounds = array<i64: 1, 8, 24>}, {transform_indices = @transform_1, window_bounds = array<i64: 1, 8, 4>}, {pipeline_mode = #tpu.pipeline_mode<synchronous>, transform_indices = @transform_2, window_bounds = array<i64: 552, 256>}, {transform_indices = @transform_3, window_bounds = array<i64: 1, 1>}, {transform_indices = @transform_4, window_bounds = array<i64: 1, 8, 1>}]} {
    %c0 = arith.constant 0 : index
    %c0_0 = arith.constant 0 : index
    %c0_1 = arith.constant 0 : index
    %0 = vector.load %arg1[%c0, %c0_0, %c0_1] : memref<1x8x24xf32, #tpu.memory_space<vmem>>, vector<1x8x24xf32>
    %1 = vector.shape_cast %0 : vector<1x8x24xf32> to vector<8x24xf32>
    %c0_2 = arith.constant 0 : index
    %c0_3 = arith.constant 0 : index
    %c0_4 = arith.constant 0 : index
    %2 = vector.load %arg2[%c0_2, %c0_3, %c0_4] : memref<1x8x4xf32, #tpu.memory_space<vmem>>, vector<1x8x4xf32>
    %3 = vector.shape_cast %2 : vector<1x8x4xf32> to vector<8x4xf32>
    %c0_5 = arith.constant 0 : index
    %c0_6 = arith.constant 0 : index
    %4 = vector.load %arg3[%c0_5, %c0_6] : memref<552x256xf32, #tpu.memory_space<vmem>>, vector<24x256xf32>
    %cst = arith.constant dense<0.000000e+00> : vector<8x256xf32>
    %5 = tpu.matmul %1, %4, %cst {dimension_numbers = #tpu.dot_dimension_numbers<[1], [0], [0], [1], [0, 0, 1, 1], [], []>} : vector<8x24xf32>, vector<24x256xf32>, vector<8x256xf32> -> vector<8x256xf32>
    %cst_7 = arith.constant dense<0.000000e+00> : vector<256xf32>
    %6 = vector.multi_reduction <add>, %5, %cst_7 [0] : vector<8x256xf32> to vector<256xf32>
    %7 = vector.shape_cast %6 : vector<256xf32> to vector<1x256xf32>
    %8 = arith.mulf %5, %5 : vector<8x256xf32>
    %cst_8 = arith.constant dense<0.000000e+00> : vector<256xf32>
    %9 = vector.multi_reduction <add>, %8, %cst_8 [0] : vector<8x256xf32> to vector<256xf32>
    %10 = vector.shape_cast %9 : vector<256xf32> to vector<1x256xf32>
    %cst_9 = arith.constant 1.250000e-01 : f32
    %11 = vector.broadcast %cst_9 : f32 to vector<1x256xf32>
    %12 = arith.mulf %7, %11 : vector<1x256xf32>
    %cst_10 = arith.constant 1.250000e-01 : f32
    %13 = vector.broadcast %cst_10 : f32 to vector<1x256xf32>
    %14 = arith.mulf %10, %13 : vector<1x256xf32>
    %15 = arith.mulf %12, %12 : vector<1x256xf32>
    %16 = arith.subf %14, %15 : vector<1x256xf32>
    %cst_11 = arith.constant 0.000000e+00 : f32
    %17 = vector.broadcast %cst_11 : f32 to vector<1x256xf32>
    %18 = arith.maximumf %16, %17 : vector<1x256xf32>
    %19 = vector.broadcast %12 : vector<1x256xf32> to vector<8x256xf32>
    %20 = arith.subf %5, %19 : vector<8x256xf32>
    %cst_12 = arith.constant 9.99999974E-6 : f32
    %21 = vector.broadcast %cst_12 : f32 to vector<1x256xf32>
    %22 = arith.addf %18, %21 : vector<1x256xf32>
    %23 = math.rsqrt %22 : vector<1x256xf32>
    %24 = vector.broadcast %23 : vector<1x256xf32> to vector<8x256xf32>
    %25 = arith.mulf %20, %24 : vector<8x256xf32>
    %cst_13 = arith.constant 0.000000e+00 : f32
    %26 = vector.broadcast %cst_13 : f32 to vector<8x256xf32>
    %27 = arith.cmpf ogt, %25, %26 : vector<8x256xf32>
    %cst_14 = arith.constant 0.00999999977 : f32
    %28 = vector.broadcast %cst_14 : f32 to vector<8x256xf32>
    %29 = arith.mulf %28, %25 : vector<8x256xf32>
    %30 = arith.select %27, %25, %29 : vector<8x256xi1>, vector<8x256xf32>
    %cst_15 = arith.constant 0.000000e+00 : f32
    %31 = vector.broadcast %cst_15 : f32 to vector<8x4xf32>
    %32 = tpu.concatenate %3, %31 in 1 : vector<8x4xf32>, vector<8x4xf32> -> vector<8x8xf32>
    %c24 = arith.constant 24 : index
    %c0_16 = arith.constant 0 : index
    %33 = vector.load %arg3[%c24, %c0_16] : memref<552x256xf32, #tpu.memory_space<vmem>>, vector<256x256xf32>
    %cst_17 = arith.constant dense<0.000000e+00> : vector<8x256xf32>
    %34 = tpu.matmul %30, %33, %cst_17 {dimension_numbers = #tpu.dot_dimension_numbers<[1], [0], [0], [1], [0, 0, 1, 1], [], []>} : vector<8x256xf32>, vector<256x256xf32>, vector<8x256xf32> -> vector<8x256xf32>
    %c280 = arith.constant 280 : index
    %c0_18 = arith.constant 0 : index
    %35 = vector.load %arg3[%c280, %c0_18] : memref<552x256xf32, #tpu.memory_space<vmem>>, vector<8x256xf32>
    %cst_19 = arith.constant dense<0.000000e+00> : vector<8x256xf32>
    %36 = tpu.matmul %32, %35, %cst_19 {dimension_numbers = #tpu.dot_dimension_numbers<[1], [0], [0], [1], [0, 0, 1, 1], [], []>} : vector<8x8xf32>, vector<8x256xf32>, vector<8x256xf32> -> vector<8x256xf32>
    %37 = arith.addf %34, %36 : vector<8x256xf32>
    %cst_20 = arith.constant dense<0.000000e+00> : vector<256xf32>
    %38 = vector.multi_reduction <add>, %37, %cst_20 [0] : vector<8x256xf32> to vector<256xf32>
    %39 = vector.shape_cast %38 : vector<256xf32> to vector<1x256xf32>
    %40 = arith.mulf %37, %37 : vector<8x256xf32>
    %cst_21 = arith.constant dense<0.000000e+00> : vector<256xf32>
    %41 = vector.multi_reduction <add>, %40, %cst_21 [0] : vector<8x256xf32> to vector<256xf32>
    %42 = vector.shape_cast %41 : vector<256xf32> to vector<1x256xf32>
    %cst_22 = arith.constant 1.250000e-01 : f32
    %43 = vector.broadcast %cst_22 : f32 to vector<1x256xf32>
    %44 = arith.mulf %39, %43 : vector<1x256xf32>
    %cst_23 = arith.constant 1.250000e-01 : f32
    %45 = vector.broadcast %cst_23 : f32 to vector<1x256xf32>
    %46 = arith.mulf %42, %45 : vector<1x256xf32>
    %47 = arith.mulf %44, %44 : vector<1x256xf32>
    %48 = arith.subf %46, %47 : vector<1x256xf32>
    %cst_24 = arith.constant 0.000000e+00 : f32
    %49 = vector.broadcast %cst_24 : f32 to vector<1x256xf32>
    %50 = arith.maximumf %48, %49 : vector<1x256xf32>
    %51 = vector.broadcast %44 : vector<1x256xf32> to vector<8x256xf32>
    %52 = arith.subf %37, %51 : vector<8x256xf32>
    %cst_25 = arith.constant 9.99999974E-6 : f32
    %53 = vector.broadcast %cst_25 : f32 to vector<1x256xf32>
    %54 = arith.addf %50, %53 : vector<1x256xf32>
    %55 = math.rsqrt %54 : vector<1x256xf32>
    %56 = vector.broadcast %55 : vector<1x256xf32> to vector<8x256xf32>
    %57 = arith.mulf %52, %56 : vector<8x256xf32>
    %cst_26 = arith.constant 0.000000e+00 : f32
    %58 = vector.broadcast %cst_26 : f32 to vector<8x256xf32>
    %59 = arith.cmpf ogt, %57, %58 : vector<8x256xf32>
    %cst_27 = arith.constant 0.00999999977 : f32
    %60 = vector.broadcast %cst_27 : f32 to vector<8x256xf32>
    %61 = arith.mulf %60, %57 : vector<8x256xf32>
    %62 = arith.select %59, %57, %61 : vector<8x256xi1>, vector<8x256xf32>
    %c288 = arith.constant 288 : index
    %c0_28 = arith.constant 0 : index
    %63 = vector.load %arg3[%c288, %c0_28] : memref<552x256xf32, #tpu.memory_space<vmem>>, vector<256x128xf32>
    %cst_29 = arith.constant dense<0.000000e+00> : vector<8x128xf32>
    %64 = tpu.matmul %62, %63, %cst_29 {dimension_numbers = #tpu.dot_dimension_numbers<[1], [0], [0], [1], [0, 0, 1, 1], [], []>} : vector<8x256xf32>, vector<256x128xf32>, vector<8x128xf32> -> vector<8x128xf32>
    %cst_30 = arith.constant dense<0.000000e+00> : vector<128xf32>
    %65 = vector.multi_reduction <add>, %64, %cst_30 [0] : vector<8x128xf32> to vector<128xf32>
    %66 = vector.shape_cast %65 : vector<128xf32> to vector<1x128xf32>
    %67 = arith.mulf %64, %64 : vector<8x128xf32>
    %cst_31 = arith.constant dense<0.000000e+00> : vector<128xf32>
    %68 = vector.multi_reduction <add>, %67, %cst_31 [0] : vector<8x128xf32> to vector<128xf32>
    %69 = vector.shape_cast %68 : vector<128xf32> to vector<1x128xf32>
    %cst_32 = arith.constant 1.250000e-01 : f32
    %70 = vector.broadcast %cst_32 : f32 to vector<1x128xf32>
    %71 = arith.mulf %66, %70 : vector<1x128xf32>
    %cst_33 = arith.constant 1.250000e-01 : f32
    %72 = vector.broadcast %cst_33 : f32 to vector<1x128xf32>
    %73 = arith.mulf %69, %72 : vector<1x128xf32>
    %74 = arith.mulf %71, %71 : vector<1x128xf32>
    %75 = arith.subf %73, %74 : vector<1x128xf32>
    %cst_34 = arith.constant 0.000000e+00 : f32
    %76 = vector.broadcast %cst_34 : f32 to vector<1x128xf32>
    %77 = arith.maximumf %75, %76 : vector<1x128xf32>
    %78 = vector.broadcast %71 : vector<1x128xf32> to vector<8x128xf32>
    %79 = arith.subf %64, %78 : vector<8x128xf32>
    %cst_35 = arith.constant 9.99999974E-6 : f32
    %80 = vector.broadcast %cst_35 : f32 to vector<1x128xf32>
    %81 = arith.addf %77, %80 : vector<1x128xf32>
    %82 = math.rsqrt %81 : vector<1x128xf32>
    %83 = vector.broadcast %82 : vector<1x128xf32> to vector<8x128xf32>
    %84 = arith.mulf %79, %83 : vector<8x128xf32>
    %cst_36 = arith.constant 0.000000e+00 : f32
    %85 = vector.broadcast %cst_36 : f32 to vector<8x128xf32>
    %86 = arith.cmpf ogt, %84, %85 : vector<8x128xf32>
    %cst_37 = arith.constant 0.00999999977 : f32
    %87 = vector.broadcast %cst_37 : f32 to vector<8x128xf32>
    %88 = arith.mulf %87, %84 : vector<8x128xf32>
    %89 = arith.select %86, %84, %88 : vector<8x128xi1>, vector<8x128xf32>
    %c544 = arith.constant 544 : index
    %c0_38 = arith.constant 0 : index
    %90 = vector.load %arg3[%c544, %c0_38] : memref<552x256xf32, #tpu.memory_space<vmem>>, vector<1x128xf32>
    %91 = vector.broadcast %90 : vector<1x128xf32> to vector<8x128xf32>
    %92 = arith.mulf %89, %91 : vector<8x128xf32>
    %cst_39 = arith.constant dense<0.000000e+00> : vector<8xf32>
    %93 = vector.multi_reduction <add>, %92, %cst_39 [1] : vector<8x128xf32> to vector<8xf32>
    %94 = vector.shape_cast %93 : vector<8xf32> to vector<8x1xf32>
    %c0_40 = arith.constant 0 : index
    %c0_41 = arith.constant 0 : index
    %95 = memref.load %arg4[%c0_40, %c0_41] : memref<1x1xf32, #tpu.memory_space<smem>>
    %96 = vector.broadcast %95 : f32 to vector<8x1xf32>
    %97 = arith.addf %94, %96 : vector<8x1xf32>
    %c0_42 = arith.constant 0 : index
    %c0_43 = arith.constant 0 : index
    %c0_44 = arith.constant 0 : index
    %98 = vector.load %arg5[%c0_42, %c0_43, %c0_44] : memref<1x8x1xf32, #tpu.memory_space<vmem>>, vector<1x8x1xf32>
    %99 = vector.shape_cast %98 : vector<1x8x1xf32> to vector<8x1xf32>
    %100 = vector.shape_cast %97 : vector<8x1xf32> to vector<1x8x1xf32>
    tpu.vector_store %arg5[%c0_42, %c0_43, %c0_44], %100 {strides = array<i32>} : memref<1x8x1xf32, #tpu.memory_space<vmem>>, vector<1x8x1xf32>,
    return
  }
  func.func @transform_0(%arg0: i32) -> (i32, i32, i32) {
    %c0_i32 = arith.constant 0 : i32
    %c0_i32_0 = arith.constant 0 : i32
    %c0_i32_1 = arith.constant 0 : i32
    return %arg0, %c0_i32, %c0_i32_0 : i32, i32, i32
  }
  func.func @transform_1(%arg0: i32) -> (i32, i32, i32) {
    %c0_i32 = arith.constant 0 : i32
    %c0_i32_0 = arith.constant 0 : i32
    %c0_i32_1 = arith.constant 0 : i32
    return %arg0, %c0_i32, %c0_i32_0 : i32, i32, i32
  }
  func.func @transform_2(%arg0: i32) -> (i32, i32) {
    %c0_i32 = arith.constant 0 : i32
    %c0_i32_0 = arith.constant 0 : i32
    %c0_i32_1 = arith.constant 0 : i32
    return %c0_i32, %c0_i32_0 : i32, i32
  }
  func.func @transform_3(%arg0: i32) -> (i32, i32) {
    %c0_i32 = arith.constant 0 : i32
    %c0_i32_0 = arith.constant 0 : i32
    %c0_i32_1 = arith.constant 0 : i32
    return %c0_i32, %c0_i32_0 : i32, i32
  }
  func.func @transform_4(%arg0: i32) -> (i32, i32, i32) {
    %c0_i32 = arith.constant 0 : i32
    %c0_i32_0 = arith.constant 0 : i32
    %c0_i32_1 = arith.constant 0 : i32
    return %arg0, %c0_i32, %c0_i32_0 : i32, i32, i32
  }
}

</mosaic_0001>

<bundles_post_ra>
// kernel: tpu_custom_call.1
= control target key start
LH: loop header
LB: loop body
LE: loop exit
PB: predicated region body
PF: predicated region fallthrough
CT: control target
= control target key end

     0   :  { %s1161_s0 = inlined_call_operand.vmem [shape: f32[4,8,24], index: 0, kind: input, shape index: {}]   ;;  %s1162_s1 = inlined_call_operand.vmem [shape: f32[4,8,4], index: 1, kind: input, shape index: {}]   ;;  %s1163_s2 = inlined_call_operand.hbm [shape: f32[552,256], index: 2, kind: input, shape index: {}]   ;;  %s1164_s3 = inlined_call_operand.<no memory space> [shape: f32[1,1], index: 3, kind: input, shape index: {}]   ;;  %s1165_s4 = inlined_call_operand.vmem [shape: f32[4,8,1], index: 4, kind: output, shape index: {}]  }
   0x1   :  { %9 = sst [smem:[#allocation2]] %s1164_s3 }
   0x2   :  { %10 = vsyncpa [#allocation4], 0  ;;  %s1091_s17 = smov 0  }
   0x3 LB: > { %s1097_s18 = sadd.s32 4294967295, %s1057_s17   ;;  %p838_p0 = scmp.ge.s32.totalorder %s1057_s17, 1  ;;  %s1057_s17 = sphi %s1091_s17, %s16_s17  }
   0x4   : > { %p141_p1 = scmp.lt.s32.totalorder %s1057_s17, 5  ;;  %s1059_s19 = smov [#allocation3]  }
   0x5   : > { %s153_s20 = sshll.u32 %s1059_s19, 4  ;;  %p1166_p3 = scmp.eq.s32.totalorder %s1097_s18, 0  ;;  %s154_s20 = int_to_ptr.vmem [resolvable:$true] %s153_s20 }
   0x6   : > { %p1101_p2 = pnand %p838_p0, %p141_p1  ;;  %s1019_s24 = scalar_lea.hbm %s1163_s2, 17664 }
   0x7   : > { %p1020_p6 = scmp.ne.s32.totalorder %s1163_s2, %s1019_s24  ;;  %p1026_p10 = scmp.lt.u32.totalorder %s1019_s24, %s1163_s2 }
   0x8   : > { %s1168_s3 = scalar_select %p1101_p2, 1, 0 }
   0x9   : > { %p991_p4 = pneg %p1101_p2 }
   0xb   : > { %p1110_p5 = pnand %p1166_p3, %p991_p4 }
   0xd   : > { %p1021_p7 = pneg %p1110_p5 }
   0xf   : > { %p1022_p8 = pnand %p1021_p7, %p1020_p6 }
  0x11   : > { %p1023_p9 = pneg %p1022_p8 }
  0x13   : > { %p1028_p11 = pnand %p1026_p10, %p1023_p9 }
  0x15   : > { %1031 = shalt.err (!%p1028_p11)
}
  0x16   : > { %s1032_s29 = scalar_lea.vmem %s154_s20, 17664  ;;  %p1040_p1 = scmp.lt.s32.totalorder %s154_s20, %s154_s20 }
  0x17   : > { %p1033_p12 = scmp.ne.s32.totalorder %s154_s20, %s1032_s29  ;;  %p1041_p4 = scmp.lt.s32.totalorder %s1032_s29, %s1032_s29 }
  0x19   : > { %p1035_p13 = pnand %p1033_p12, %p1021_p7  ;;  %p1042_p3 = por %p1041_p4, %p1040_p1 }
  0x1b   : > { %p1036_p0 = pneg %p1035_p13 }
  0x1d   : > { %p1043_p2 = pnand %p1042_p3, %p1036_p0 }
  0x1f   : > { %1046 = shalt.err (!%p1043_p2)
}
  0x20   : > { %s1060_s30 = smov 256   ;;  %s1061_s5 = smov 16  }
  0x21   : > { %994 = dma.hbm_to_vmem [thread:$0]  (!%p1110_p5), %s1163_s2, 17664, %s154_s20, [#allocation4], %s1060_s30, %s1060_s30, %s1061_s5  }
  0x22   : > { %p1170_p6 = scmp.ne.s32.totalorder %s1168_s3, 0 }
  0x23   : > { %p1171_p8 = scmp.eq.s32.totalorder (!%p1170_p6), %s1097_s18, 0 }
  0x24   : > { %186 = sbr.rel (%p1170_p6) target bundleno = 959 (0x3bf), region = 36 }
  0x2b   : > { %1052 = dma.done.wait (%p1171_p8), [#allocation4], 17664   ;;  %p1172_p7 = pmov %p1171_p8 }
  0x2c   : > { %p214_p2 = scmp.lt.s32.totalorder %s1097_s18, 3  ;;  %v1062_v0 = vmov 0.0   ;;  %v229_v1 = vld [vmem:[#allocation3 + $0x8] sm:$0xff]  ;;  %v231_v2 = vld [vmem:[#allocation3 + $0x18] sm:$0xff]  ;;  %v228_v3 = vld [vmem:[#allocation3] sm:$0xff]  ;;  %vm234_vm0 = vcmask 195584  }
  0x2d   : > { %1054 = vsyncadd (%p1172_p7), [#allocation4], 4294949632  ;;  %302 = vmatprep.mubr.f32.mxu0 %v1062_v0  ;;  %v885_v4 = vpack.c.bf16 %v231_v2, %v229_v1  ;;  %v230_v5 = vld [vmem:[#allocation3 + $0x10] sm:$0xff]  ;;  %v233_v7 = vld [vmem:[#allocation3 + $0x28] sm:$0xff]  ;;  %vm359_vm1 = vcmask 31744   ;;  %vm427_vm2 = vcmask 64512  }
  0x2e   : > { %s1174_s18 = smov (!%p214_p2, %s1097_s18), 3  ;;  %v887_v6 = vpack.c.bf16 %v230_v5, %v228_v3  ;;  %v362_v8 = vld [vmem:[#allocation3 + $0x38] sm:$0xff]  ;;  %v364_v9 = vld [vmem:[#allocation3 + $0x48] sm:$0xff]  ;;  %v361_v11 = vld [vmem:[#allocation3 + $0x30] sm:$0xff]  ;;  %s754_s15 = sld [smem:[#allocation2]]  ;;  %vm757_vm8 = vcmask 7168  }
  0x2f   : > { %s1138_s8 = sshll.u32 %s1174_s18, 3  ;;  %886 = vmatprep.subr.bf16.mxu0 %v885_v4  ;;  %v889_v10 = vpack.c.bf16 %v364_v9, %v362_v8  ;;  %v363_v12 = vld [vmem:[#allocation3 + $0x40] sm:$0xff]  ;;  %v366_v13 = vld [vmem:[#allocation3 + $0x58] sm:$0xff]  ;;  %v368_v15 = vld [vmem:[#allocation3 + $0x68] sm:$0xff] }
  0x30   : > { %s217_s11 = scalar_lea.vmem %s1161_s0, %s1138_s8  ;;  %888 = vmatpush1.bf16.msra.mxu0 %v887_v6  ;;  %v891_v14 = vpack.c.bf16 %v363_v12, %v361_v11  ;;  %v365_v16 = vld [vmem:[#allocation3 + $0x50] sm:$0xff]  ;;  %v367_v17 = vld [vmem:[#allocation3 + $0x60] sm:$0xff]  ;;  %v893_v19 = vpack.c.bf16 %v368_v15, %v366_v13  ;;  %v370_v20 = vld [vmem:[#allocation3 + $0x78] sm:$0xff]  ;;  %s221_s14 = scalar_lea.vmem %s1162_s1, %s1138_s8 }
  0x31   : > { %242 = vmatprep.subr.mxu0 %v233_v7  ;;  %v232_v18 = vld [vmem:[#allocation3 + $0x20] sm:$0xff]  ;;  %890 = vmatprep.subr.bf16.mxu1 %v889_v10  ;;  %v372_v21 = vld [vmem:[#allocation3 + $0x88] sm:$0xff]  ;;  %v895_v23 = vpack.c.bf16 %v367_v17, %v365_v16  ;;  %v369_v25 = vld [vmem:[#allocation3 + $0x70] sm:$0xff]  ;;  %s225_s19 = scalar_lea.vmem %s1165_s4, %s1138_s8 }
  0x32   : > { %v226_v22 = vld [vmem:[%s217_s11] sm:$0xff]  ;;  %892 = vmatpush1.bf16.msra.mxu1 %v891_v14  ;;  %v897_v24 = vpack.c.bf16 %v372_v21, %v370_v20  ;;  %v374_v27 = vld [vmem:[#allocation3 + $0x98] sm:$0xff]  ;;  %v376_v28 = vld [vmem:[#allocation3 + $0xa8] sm:$0xff] }
  0x33   : > { %894 = vmatprep.subr.bf16.mxu1 %v893_v19  ;;  %v371_v26 = vld [vmem:[#allocation3 + $0x80] sm:$0xff]  ;;  %v901_v30 = vpack.c.bf16 %v376_v28, %v374_v27  ;;  %v373_v31 = vld [vmem:[#allocation3 + $0x90] sm:$0xff]  ;;  %v378_v33 = vld [vmem:[#allocation3 + $0xb8] sm:$0xff] }
  0x34   : > { %243 = vmatpush1.msra.mxu0 %v232_v18  ;;  %v899_v29 = vpack.c.bf16 %v371_v26, %v369_v25  ;;  %v375_v32 = vld [vmem:[#allocation3 + $0xa0] sm:$0xff]  ;;  %v380_v34 = vld [vmem:[#allocation3 + $0xc8] sm:$0xff]  ;;  %v377_v37 = vld [vmem:[#allocation3 + $0xb0] sm:$0xff] }
  0x35   : > { %846 = vmatmul.mubr.msk.f32.vlgmr.msra.gmra.mrb[0].mxu0 %vm234_vm0, %v226_v22  ;;  %v903_v35 = vpack.c.bf16 %v375_v32, %v373_v31  ;;  %v905_v36 = vpack.c.bf16 %v380_v34, %v378_v33  ;;  %v379_v38 = vld [vmem:[#allocation3 + $0xc0] sm:$0xff]  ;;  %v382_v39 = vld [vmem:[#allocation3 + $0xd8] sm:$0xff]  ;;  %v384_v40 = vld [vmem:[#allocation3 + $0xe8] sm:$0xff] }
  0x36   : > { %896 = vmatpush1.bf16.msra.mxu1 %v895_v23  ;;  %495 = vmatprep.mubr.f32.mxu0 %v1062_v0  ;;  %v907_v41 = vpack.c.bf16 %v379_v38, %v377_v37  ;;  %v909_v42 = vpack.c.bf16 %v384_v40, %v382_v39  ;;  %v381_v43 = vld [vmem:[#allocation3 + $0xd0] sm:$0xff]  ;;  %v383_v44 = vld [vmem:[#allocation3 + $0xe0] sm:$0xff]  ;;  %v386_v46 = vld [vmem:[#allocation3 + $0xf8] sm:$0xff] }
  0x37   : > { %898 = vmatprep.subr.bf16.mxu1 %v897_v24  ;;  %v911_v45 = vpack.c.bf16 %v383_v44, %v381_v43  ;;  %v388_v47 = vld [vmem:[#allocation3 + $0x108] sm:$0xff]  ;;  %v385_v49 = vld [vmem:[#allocation3 + $0xf0] sm:$0xff]  ;;  %v387_v50 = vld [vmem:[#allocation3 + $0x100] sm:$0xff] }
  0x38   : > { %v913_v48 = vpack.c.bf16 %v388_v47, %v386_v46  ;;  %v915_v51 = vpack.c.bf16 %v387_v50, %v385_v49  ;;  %v390_v52 = vld [vmem:[#allocation3 + $0x118] sm:$0xff]  ;;  %v392_v53 = vld [vmem:[#allocation3 + $0x128] sm:$0xff]  ;;  %v389_v55 = vld [vmem:[#allocation3 + $0x110] sm:$0xff] }
  0x39   : > { %v917_v54 = vpack.c.bf16 %v392_v53, %v390_v52  ;;  %v391_v56 = vld [vmem:[#allocation3 + $0x120] sm:$0xff]  ;;  %v394_v58 = vld [vmem:[#allocation3 + $0x138] sm:$0xff]  ;;  %v396_v59 = vld [vmem:[#allocation3 + $0x148] sm:$0xff] }
  0x3a   : > { %900 = vmatpush1.bf16.msra.mxu1 %v899_v29  ;;  %v919_v57 = vpack.c.bf16 %v391_v56, %v389_v55  ;;  %v921_v60 = vpack.c.bf16 %v396_v59, %v394_v58  ;;  %v393_v61 = vld [vmem:[#allocation3 + $0x130] sm:$0xff]  ;;  %v395_v62 = vld [vmem:[#allocation3 + $0x140] sm:$0xff]  ;;  %v398_v0 = vld [vmem:[#allocation3 + $0x158] sm:$0xff] }
  0x3b   : > { %902 = vmatprep.subr.bf16.mxu1 %v901_v30  ;;  %v923_v63 = vpack.c.bf16 %v395_v62, %v393_v61  ;;  %v400_v1 = vld [vmem:[#allocation3 + $0x168] sm:$0xff]  ;;  %v397_v3 = vld [vmem:[#allocation3 + $0x150] sm:$0xff]  ;;  %v399_v4 = vld [vmem:[#allocation3 + $0x160] sm:$0xff] }
  0x3c   : > { %v925_v2 = vpack.c.bf16 %v400_v1, %v398_v0  ;;  %v927_v5 = vpack.c.bf16 %v399_v4, %v397_v3  ;;  %v402_v6 = vld [vmem:[#allocation3 + $0x178] sm:$0xff]  ;;  %v404_v7 = vld [vmem:[#allocation3 + $0x188] sm:$0xff]  ;;  %v401_v9 = vld [vmem:[#allocation3 + $0x170] sm:$0xff] }
  0x3d   : > { %v929_v8 = vpack.c.bf16 %v404_v7, %v402_v6  ;;  %v403_v10 = vld [vmem:[#allocation3 + $0x180] sm:$0xff]  ;;  %v406_v12 = vld [vmem:[#allocation3 + $0x198] sm:$0xff]  ;;  %v408_v13 = vld [vmem:[#allocation3 + $0x1a8] sm:$0xff] }
  0x3e   : > { %904 = vmatpush1.bf16.msra.mxu1 %v903_v35  ;;  %v931_v11 = vpack.c.bf16 %v403_v10, %v401_v9  ;;  %v933_v14 = vpack.c.bf16 %v408_v13, %v406_v12  ;;  %v405_v15 = vld [vmem:[#allocation3 + $0x190] sm:$0xff]  ;;  %v407_v16 = vld [vmem:[#allocation3 + $0x1a0] sm:$0xff]  ;;  %v410_v18 = vld [vmem:[#allocation3 + $0x1b8] sm:$0xff] }
  0x3f   : > { %906 = vmatprep.subr.bf16.mxu1 %v905_v36  ;;  %v935_v17 = vpack.c.bf16 %v407_v16, %v405_v15  ;;  %v412_v19 = vld [vmem:[#allocation3 + $0x1c8] sm:$0xff]  ;;  %v409_v21 = vld [vmem:[#allocation3 + $0x1b0] sm:$0xff]  ;;  %v411_v22 = vld [vmem:[#allocation3 + $0x1c0] sm:$0xff] }
  0x40   : > { %v937_v20 = vpack.c.bf16 %v412_v19, %v410_v18  ;;  %v939_v23 = vpack.c.bf16 %v411_v22, %v409_v21  ;;  %v414_v24 = vld [vmem:[#allocation3 + $0x1d8] sm:$0xff]  ;;  %v416_v25 = vld [vmem:[#allocation3 + $0x1e8] sm:$0xff]  ;;  %v413_v26 = vld [vmem:[#allocation3 + $0x1d0] sm:$0xff] }
  0x41   : > { %v941_v27 = vpack.c.bf16 %v416_v25, %v414_v24  ;;  %v415_v28 = vld [vmem:[#allocation3 + $0x1e0] sm:$0xff]  ;;  %v418_v29 = vld [vmem:[#allocation3 + $0x1f8] sm:$0xff]  ;;  %v420_v30 = vld [vmem:[#allocation3 + $0x208] sm:$0xff] }
  0x42   : > { %908 = vmatpush1.bf16.msra.mxu1 %v907_v41  ;;  %v943_v31 = vpack.c.bf16 %v415_v28, %v413_v26  ;;  %v426_v32 = vld [vmem:[#allocation3 + $0x238] sm:$0xff]  ;;  %v945_v33 = vpack.c.bf16 %v420_v30, %v418_v29  ;;  %v417_v34 = vld [vmem:[#allocation3 + $0x1f0] sm:$0xff]  ;;  %v419_v35 = vld [vmem:[#allocation3 + $0x200] sm:$0xff] }
  0x43   : > { %910 = vmatprep.subr.bf16.mxu1 %v909_v42  ;;  %431 = vmatprep.subr.mxu0 %v426_v32  ;;  %v425_v36 = vld [vmem:[#allocation3 + $0x230] sm:$0xff]  ;;  %v422_v37 = vld [vmem:[#allocation3 + $0x218] sm:$0xff]  ;;  %v424_v38 = vld [vmem:[#allocation3 + $0x228] sm:$0xff]  ;;  %v947_v41 = vpack.c.bf16 %v419_v35, %v417_v34 }
  0x44   : > { %432 = vmatpush1.msra.mxu0 %v425_v36  ;;  %v227_v39 = vld [vmem:[%s221_s14] sm:$0xff]  ;;  %v949_v42 = vpack.c.bf16 %v424_v38, %v422_v37  ;;  %v421_v43 = vld [vmem:[#allocation3 + $0x210] sm:$0xff] }
  0x45   : > { %v360_v40 = vsel %vm359_vm1, %v227_v39, 0.0  ;;  %v423_v44 = vld [vmem:[#allocation3 + $0x220] sm:$0xff]  ;;  %v640_v35 = vld [vmem:[#allocation3 + $0x350] sm:$0xff] }
  0x46   : > { %912 = vmatpush1.bf16.msra.mxu1 %v911_v45  ;;  %847 = vmatmul.mubr.msk.f32.vlgmr.msra.gmra.mrb[2].mxu0 %vm427_vm2, %v360_v40  ;;  %v951_v45 = vpack.c.bf16 %v423_v44, %v421_v43  ;;  %v639_v34 = vld [vmem:[#allocation3 + $0x340] sm:$0xff]  ;;  %v624_v38 = vld [vmem:[#allocation3 + $0x250] sm:$0xff] }
  0x47   : > { %914 = vmatprep.subr.bf16.mxu1 %v913_v48  ;;  %v953_v36 = vpack.c.bf16 %v640_v35, %v639_v34  ;;  %v623_v37 = vld [vmem:[#allocation3 + $0x240] sm:$0xff]  ;;  %v626_v44 = vld [vmem:[#allocation3 + $0x270] sm:$0xff] }
  0x48   : > { %v955_v39 = vpack.c.bf16 %v624_v38, %v623_v37  ;;  %v641_v40 = vld [vmem:[#allocation3 + $0x360] sm:$0xff] }
  0x49   : > { %954 = vmatprep.subr.bf16.mxu0 %v953_v36  ;;  %v625_v43 = vld [vmem:[#allocation3 + $0x260] sm:$0xff] }
  0x4a   : > { %916 = vmatpush1.bf16.msra.mxu1 %v915_v51  ;;  %956 = vmatpush3.bf16.msra.mxu0 %v955_v39 }
  0x4b   : > { %918 = vmatprep.subr.bf16.mxu1 %v917_v54 }
  0x4e   : > { %920 = vmatpush1.bf16.msra.mxu1 %v919_v57 }
  0x4f   : > { %922 = vmatprep.subr.bf16.mxu1 %v921_v60 }
  0x52   : > { %924 = vmatpush1.bf16.msra.mxu1 %v923_v63 }
  0x53   : > { %926 = vmatprep.subr.bf16.mxu1 %v925_v2 }
  0x56   : > { %928 = vmatpush1.bf16.msra.mxu1 %v927_v5 }
  0x57   : > { %930 = vmatprep.subr.bf16.mxu1 %v929_v8 }
  0x5a   : > { %932 = vmatpush1.bf16.msra.mxu1 %v931_v11 }
  0x5b   : > { %934 = vmatprep.subr.bf16.mxu1 %v933_v14 }
  0x5e   : > { %936 = vmatpush1.bf16.msra.mxu1 %v935_v17 }
  0x5f   : > { %938 = vmatprep.subr.bf16.mxu1 %v937_v20 }
  0x62   : > { %940 = vmatpush1.bf16.msra.mxu1 %v939_v23 }
  0x63   : > { %942 = vmatprep.subr.bf16.mxu1 %v941_v27 }
  0x66   : > { %944 = vmatpush1.bf16.msra.mxu1 %v943_v31 }
  0x67   : > { %946 = vmatprep.subr.bf16.mxu1 %v945_v33 }
  0x6a   : > { %948 = vmatpush1.bf16.msra.mxu1 %v947_v41  ;;  %v642_v41 = vld [vmem:[#allocation3 + $0x370] sm:$0xff] }
  0x6b   : > { %950 = vmatprep.subr.bf16.mxu1 %v949_v42  ;;  %v957_v42 = vpack.c.bf16 %v642_v41, %v641_v40 }
  0x6d   : > { %958 = vmatprep.subr.bf16.mxu0 %v957_v42 }
  0x6e   : > { %952 = vmatpush1.bf16.msra.mxu1 %v951_v45  ;;  %v959_v45 = vpack.c.bf16 %v626_v44, %v625_v43 }
  0x70   : > { %960 = vmatpush3.bf16.msra.mxu0 %v959_v45 }
 0x108   : > { %v304_v46 = vpop.f32.mrb[0].mxu0 }
 0x109   : > { %v309_v47 = vrot.slane %v304_v46, 4  ;;  %v321_v48 = vmul.f32 %v304_v46, %v304_v46  ;;  %v306_v49 = vpop.f32.mrb[1].mxu0 }
 0x10a   : > { %v315_v50 = vrot.slane %v306_v49, 4  ;;  %v322_v51 = vmul.f32 %v306_v49, %v306_v49 }
 0x10b   : > { %v310_v52 = vadd.f32 %v309_v47, %v304_v46  ;;  %v323_v53 = vrot.slane %v321_v48, 4  ;;  %v644_v47 = vld [vmem:[#allocation3 + $0x390] sm:$0xff] }
 0x10c   : > { %v316_v54 = vadd.f32 %v315_v50, %v306_v49  ;;  %v329_v55 = vrot.slane %v322_v51, 4  ;;  %v628_v50 = vld [vmem:[#allocation3 + $0x290] sm:$0xff] }
 0x10d   : > { %v311_v56 = vrot.slane %v310_v52, 2  ;;  %v324_v57 = vadd.f32 %v323_v53, %v321_v48  ;;  %v646_v53 = vld [vmem:[#allocation3 + $0x3b0] sm:$0xff] }
 0x10e   : > { %v317_v58 = vrot.slane %v316_v54, 2  ;;  %v330_v59 = vadd.f32 %v329_v55, %v322_v51  ;;  %v629_v55 = vld [vmem:[#allocation3 + $0x2a0] sm:$0xff] }
 0x10f   : > { %v312_v60 = vadd.f32 %v311_v56, %v310_v52  ;;  %v325_v61 = vrot.slane %v324_v57, 2  ;;  %v645_v52 = vld [vmem:[#allocation3 + $0x3a0] sm:$0xff]  ;;  %v630_v56 = vld [vmem:[#allocation3 + $0x2b0] sm:$0xff] }
 0x110   : > { %v318_v62 = vadd.f32 %v317_v58, %v316_v54  ;;  %v331_v63 = vrot.slane %v330_v59, 2  ;;  %v965_v54 = vpack.c.bf16 %v646_v53, %v645_v52  ;;  %v647_v58 = vld [vmem:[#allocation3 + $0x3c0] sm:$0xff] }
 0x111   : > { %v313_v0 = vrot.slane %v312_v60, 1  ;;  %v326_v1 = vadd.f32 %v325_v61, %v324_v57  ;;  %v967_v57 = vpack.c.bf16 %v630_v56, %v629_v55  ;;  %v631_v61 = vld [vmem:[#allocation3 + $0x2c0] sm:$0xff] }
 0x112   : > { %v319_v2 = vrot.slane %v318_v62, 1  ;;  %v332_v3 = vadd.f32 %v331_v63, %v330_v59  ;;  %v648_v59 = vld [vmem:[#allocation3 + $0x3d0] sm:$0xff]  ;;  %v649_v63 = vld [vmem:[#allocation3 + $0x3e0] sm:$0xff] }
 0x113   : > { %v314_v4 = vadd.f32 %v313_v0, %v312_v60  ;;  %v327_v5 = vrot.slane %v326_v1, 1  ;;  %v969_v60 = vpack.c.bf16 %v648_v59, %v647_v58 }
 0x114   : > { %v320_v6 = vadd.f32 %v319_v2, %v318_v62  ;;  %v333_v7 = vrot.slane %v332_v3, 1  ;;  %v632_v62 = vld [vmem:[#allocation3 + $0x2d0] sm:$0xff]  ;;  %v633_v2 = vld [vmem:[#allocation3 + $0x2e0] sm:$0xff] }
 0x115   : > { %v328_v8 = vadd.f32 %v327_v5, %v326_v1  ;;  %v335_v9 = vmul.f32 0.125, %v314_v4  ;;  %v971_v0 = vpack.c.bf16 %v632_v62, %v631_v61  ;;  %v650_v1 = vld [vmem:[#allocation3 + $0x3f0] sm:$0xff]  ;;  %v651_v5 = vld [vmem:[#allocation3 + $0x400] sm:$0xff] }
 0x116   : > { %v334_v10 = vadd.f32 %v333_v7, %v332_v3  ;;  %v336_v11 = vmul.f32 0.125, %v320_v6  ;;  %v634_v3 = vld [vmem:[#allocation3 + $0x2f0] sm:$0xff]  ;;  %v973_v4 = vpack.c.bf16 %v650_v1, %v649_v63 }
 0x117   : > { %v337_v12 = vmul.f32 0.125, %v328_v8  ;;  %v339_v13 = vmul.f32 %v335_v9, %v335_v9  ;;  %v345_v22 = vsub.f32 %v304_v46, %v335_v9  ;;  %v643_v46 = vld [vmem:[#allocation3 + $0x380] sm:$0xff]  ;;  %v652_v6 = vld [vmem:[#allocation3 + $0x410] sm:$0xff]  ;;  %v975_v7 = vpack.c.bf16 %v634_v3, %v633_v2 }
 0x118   : > { %v338_v14 = vmul.f32 0.125, %v334_v10  ;;  %v340_v15 = vmul.f32 %v336_v11, %v336_v11  ;;  %v346_v24 = vsub.f32 %v306_v49, %v336_v11  ;;  %v961_v48 = vpack.c.bf16 %v644_v47, %v643_v46  ;;  %v627_v49 = vld [vmem:[#allocation3 + $0x280] sm:$0xff]  ;;  %v636_v10 = vld [vmem:[#allocation3 + $0x310] sm:$0xff] }
 0x119   : > { %v341_v16 = vsub.f32 %v337_v12, %v339_v13  ;;  %v1148_v32 = vpop.f32.mrb[2].mxu0  ;;  %v963_v51 = vpack.c.bf16 %v628_v50, %v627_v49  ;;  %v977_v8 = vpack.c.bf16 %v652_v6, %v651_v5  ;;  %v635_v9 = vld [vmem:[#allocation3 + $0x300] sm:$0xff]  ;;  %v654_v12 = vld [vmem:[#allocation3 + $0x430] sm:$0xff] }
 0x11a   : > { %v342_v17 = vsub.f32 %v338_v14, %v340_v15  ;;  %v1150_v33 = vpop.f32.mrb[3].mxu0  ;;  %962 = vmatprep.subr.bf16.mxu0 %v961_v48  ;;  %v653_v11 = vld [vmem:[#allocation3 + $0x420] sm:$0xff]  ;;  %v979_v13 = vpack.c.bf16 %v636_v10, %v635_v9 }
 0x11b   : > { %v343_v18 = vmax.f32 %v341_v16, 0.0  ;;  %964 = vmatpush3.bf16.msra.mxu0 %v963_v51  ;;  %v981_v14 = vpack.c.bf16 %v654_v12, %v653_v11  ;;  %v637_v15 = vld [vmem:[#allocation3 + $0x320] sm:$0xff]  ;;  %v638_v16 = vld [vmem:[#allocation3 + $0x330] sm:$0xff] }
 0x11c   : > { %v344_v19 = vmax.f32 %v342_v17, 0.0  ;;  %966 = vmatprep.subr.bf16.mxu0 %v965_v54  ;;  %v983_v17 = vpack.c.bf16 %v638_v16, %v637_v15 }
 0x11d   : > { %v347_v20 = vadd.f32 1e-05, %v343_v18 }
 0x11e   : > { %v348_v21 = vadd.f32 1e-05, %v344_v19 }
 0x11f   : > { %1009 = vrsqrt.f32 %v347_v20  ;;  %968 = vmatpush3.bf16.msra.mxu0 %v967_v57 }
 0x120   : > { %1011 = vrsqrt.f32 %v348_v21  ;;  %970 = vmatprep.subr.bf16.mxu0 %v969_v60 }
 0x123   : > { %972 = vmatpush3.bf16.msra.mxu0 %v971_v0 }
 0x124   : > { %974 = vmatprep.subr.bf16.mxu0 %v973_v4 }
 0x127   : > { %976 = vmatpush3.bf16.msra.mxu0 %v975_v7 }
 0x128   : > { %978 = vmatprep.subr.bf16.mxu0 %v977_v8 }
 0x129   : > { %v1010_v23 = vpop.eup %1009 }
 0x12a   : > { %v1012_v25 = vpop.eup %1011  ;;  %v351_v26 = vmul.f32 %v1010_v23, %v345_v22 }
 0x12b   : > { %v352_v27 = vmul.f32 %v1012_v25, %v346_v24  ;;  %980 = vmatpush3.bf16.msra.mxu0 %v979_v13 }
 0x12c   : > { %v355_v28 = vmul.f32 0.01, %v351_v26  ;;  %vm353_vm4 = vcmp.gt.f32.partialorder %v351_v26, 0.0  ;;  %982 = vmatprep.subr.bf16.mxu0 %v981_v14 }
 0x12d   : > { %vm354_vm3 = vcmp.gt.f32.partialorder %v352_v27, 0.0  ;;  %v356_v29 = vmul.f32 0.01, %v352_v27 }
 0x12e   : > { %v357_v31 = vsel %vm353_vm4, %v351_v26, %v355_v28 }
 0x12f   : > { %v358_v30 = vsel %vm354_vm3, %v352_v27, %v356_v29  ;;  %984 = vmatpush3.bf16.msra.mxu0 %v983_v17 }
 0x130   : > { %566 = vmatprep.mubr.f32.mxu1 %v358_v30 }
 0x131   : > { %567 = vmatmul.mubr.f32.vlgmr.msra.gmra.mrb[0].mxu1 %v357_v31 }
 0x204   : > { %v568_v18 = vpop.f32.mrb[0].mxu1 }
 0x205   : > { %v569_v19 = vadd.f32 %v568_v18, %v1148_v32  ;;  %v570_v20 = vpop.f32.mrb[1].mxu1 }
 0x206   : > { %v571_v21 = vadd.f32 %v570_v20, %v1150_v33 }
 0x207   : > { %v573_v22 = vrot.slane %v569_v19, 4  ;;  %v585_v23 = vmul.f32 %v569_v19, %v569_v19 }
 0x208   : > { %v579_v24 = vrot.slane %v571_v21, 4  ;;  %v586_v25 = vmul.f32 %v571_v21, %v571_v21 }
 0x209   : > { %v574_v26 = vadd.f32 %v573_v22, %v569_v19  ;;  %v587_v27 = vrot.slane %v585_v23, 4 }
 0x20a   : > { %v580_v28 = vadd.f32 %v579_v24, %v571_v21  ;;  %v593_v29 = vrot.slane %v586_v25, 4 }
 0x20b   : > { %v575_v30 = vrot.slane %v574_v26, 2  ;;  %v588_v31 = vadd.f32 %v587_v27, %v585_v23 }
 0x20c   : > { %v581_v34 = vrot.slane %v580_v28, 2  ;;  %v594_v35 = vadd.f32 %v593_v29, %v586_v25 }
 0x20d   : > { %v576_v36 = vadd.f32 %v575_v30, %v574_v26  ;;  %v589_v37 = vrot.slane %v588_v31, 2 }
 0x20e   : > { %v582_v38 = vadd.f32 %v581_v34, %v580_v28  ;;  %v595_v39 = vrot.slane %v594_v35, 2  ;;  %v750_v34 = vld [vmem:[#allocation3 + $0x440] ss:$0 sm:$0xff] }
 0x20f   : > { %v577_v32 = vrot.slane %v576_v36, 1  ;;  %v590_v40 = vadd.f32 %v589_v37, %v588_v31  ;;  %v755_v37 = vstv %s754_s15 }
 0x210   : > { %v583_v41 = vrot.slane %v582_v38, 1  ;;  %v596_v33 = vadd.f32 %v595_v39, %v594_v35 }
 0x211   : > { %v578_v42 = vadd.f32 %v577_v32, %v576_v36  ;;  %v591_v43 = vrot.slane %v590_v40, 1 }
 0x212   : > { %v597_v44 = vrot.slane %v596_v33, 1  ;;  %v584_v45 = vadd.f32 %v583_v41, %v582_v38 }
 0x213   : > { %v592_v46 = vadd.f32 %v591_v43, %v590_v40  ;;  %v599_v47 = vmul.f32 0.125, %v578_v42 }
 0x214   : > { %v598_v48 = vadd.f32 %v597_v44, %v596_v33  ;;  %v600_v49 = vmul.f32 0.125, %v584_v45 }
 0x215   : > { %v601_v50 = vmul.f32 0.125, %v592_v46  ;;  %v603_v51 = vmul.f32 %v599_v47, %v599_v47  ;;  %v609_v60 = vsub.f32 %v569_v19, %v599_v47 }
 0x216   : > { %v602_v52 = vmul.f32 0.125, %v598_v48  ;;  %v604_v53 = vmul.f32 %v600_v49, %v600_v49  ;;  %v610_v62 = vsub.f32 %v571_v21, %v600_v49 }
 0x217   : > { %v605_v54 = vsub.f32 %v601_v50, %v603_v51 }
 0x218   : > { %v606_v55 = vsub.f32 %v602_v52, %v604_v53 }
 0x219   : > { %v607_v56 = vmax.f32 %v605_v54, 0.0 }
 0x21a   : > { %v608_v57 = vmax.f32 %v606_v55, 0.0 }
 0x21b   : > { %v611_v58 = vadd.f32 1e-05, %v607_v56 }
 0x21c   : > { %v612_v59 = vadd.f32 1e-05, %v608_v57 }
 0x21d   : > { %1013 = vrsqrt.f32 %v611_v58 }
 0x21e   : > { %1015 = vrsqrt.f32 %v612_v59 }
 0x227   : > { %v1014_v61 = vpop.eup %1013 }
 0x228   : > { %v1016_v63 = vpop.eup %1015  ;;  %v615_v0 = vmul.f32 %v1014_v61, %v609_v60 }
 0x229   : > { %v616_v1 = vmul.f32 %v1016_v63, %v610_v62 }
 0x22a   : > { %v619_v2 = vmul.f32 0.01, %v615_v0  ;;  %vm617_vm6 = vcmp.gt.f32.partialorder %v615_v0, 0.0 }
 0x22b   : > { %vm618_vm5 = vcmp.gt.f32.partialorder %v616_v1, 0.0  ;;  %v620_v3 = vmul.f32 0.01, %v616_v1 }
 0x22c   : > { %v621_v5 = vsel %vm617_vm6, %v615_v0, %v619_v2 }
 0x22d   : > { %v622_v4 = vsel %vm618_vm5, %v616_v1, %v620_v3 }
 0x22e   : > { %719 = vmatprep.mubr.f32.mxu0 %v622_v4 }
 0x22f   : > { %720 = vmatmul.mubr.f32.vlgmr.msra.gmra.mrb[4].mxu0 %v621_v5 }
 0x302   : > { %v882_v6 = vpop.f32.mrb[4].mxu0 }
 0x303   : > { %v883_v7 = vpop.f32.mrb[5].mxu0 }
 0x304   : > { %v884_v8 = vadd.f32 %v883_v7, %v882_v6 }
 0x306   : > { %v725_v9 = vrot.slane %v884_v8, 4  ;;  %v731_v10 = vmul.f32 %v884_v8, %v884_v8 }
 0x308   : > { %v726_v11 = vadd.f32 %v884_v8, %v725_v9  ;;  %v732_v12 = vrot.slane %v731_v10, 4 }
 0x30a   : > { %v727_v13 = vrot.slane %v726_v11, 2  ;;  %v733_v14 = vadd.f32 %v732_v12, %v731_v10 }
 0x30c   : > { %v728_v15 = vadd.f32 %v727_v13, %v726_v11  ;;  %v734_v16 = vrot.slane %v733_v14, 2 }
 0x30e   : > { %v735_v17 = vadd.f32 %v734_v16, %v733_v14  ;;  %v729_v18 = vrot.slane %v728_v15, 1 }
 0x310   : > { %v736_v19 = vrot.slane %v735_v17, 1  ;;  %v730_v20 = vadd.f32 %v729_v18, %v728_v15 }
 0x312   : > { %v737_v21 = vadd.f32 %v736_v19, %v735_v17  ;;  %v738_v22 = vmul.f32 0.125, %v730_v20 }
 0x314   : > { %v739_v23 = vmul.f32 0.125, %v737_v21  ;;  %v740_v24 = vmul.f32 %v738_v22, %v738_v22  ;;  %v743_v28 = vsub.f32 %v884_v8, %v738_v22 }
 0x316   : > { %v741_v25 = vsub.f32 %v739_v23, %v740_v24 }
 0x318   : > { %v742_v26 = vmax.f32 %v741_v25, 0.0 }
 0x31a   : > { %v744_v27 = vadd.f32 1e-05, %v742_v26 }
 0x31c   : > { %1017 = vrsqrt.f32 %v744_v27 }
 0x326   : > { %v1018_v29 = vpop.eup %1017 }
 0x327   : > { %v746_v30 = vmul.f32 %v1018_v29, %v743_v28 }
 0x329   : > { %vm747_vm7 = vcmp.gt.f32.partialorder %v746_v30, 0.0  ;;  %v748_v31 = vmul.f32 0.01, %v746_v30 }
 0x32b   : > { %v749_v35 = vsel %vm747_vm7, %v746_v30, %v748_v31 }
 0x32c   : > { %v751_v36 = vmul.f32 %v750_v34, %v749_v35 }
 0x32e   : > { %752 = vadd.xlane.f32.xlu0 %v751_v36 }
 0x3bb   : > { %v753_v38 = vpop.xlane.xlu0 %752 }
 0x3bc   : > { %v756_v39 = vadd.f32 %v755_v37, %v753_v38 }
 0x3be   : > { %758 = vst.msk [vmem:[%s225_s19] sm:$0xff] %vm757_vm8, %v756_v39 }
 0x3bf PF: > { %s16_s17 = sadd.s32 1, %s1057_s17  }
 0x3c0   : > { %p13_p3 = scmp.ge.s32.totalorder %s16_s17, 6  }
 0x3c2   :  { %15 = sbr.rel (!%p13_p3) target bundleno = 3 (0x3), region = 74 }
 0x3c9   :  { %778 = vsyncpa [#allocation4], 1 }
 0x3ca   :  { %780 = vsyncpa [#allocation4 + $0x1], 1 }

</bundles_post_ra>
